<compile_context>
chip_gen: v6e
topology: v6e:2x2x1
jax: 0.10.0
libtpu: 0.0.40
codegen_flags: <defaults>
</compile_context>

<pallas_src>
import functools

import jax
import jax.numpy as jnp
from jax.experimental import pallas as pl
from jax.experimental.pallas import tpu as pltpu

BETA = 0.11
_HALF_OVER_BETA = 0.5 / BETA
_LANES = 128


def _smooth_l1_kernel(off_ref, tgt_ref, msk_ref, num_ref, den_ref,
                      *, tile_r, rows_valid, needs_row_mask):
    j = pl.program_id(1)  # row-tile index (reduction axis)

    @pl.when(j == 0)
    def _():
        num_ref[...] = jnp.zeros_like(num_ref)
        den_ref[...] = jnp.zeros_like(den_ref)

    off = off_ref[...].astype(jnp.float32)   # (1, tile_r, 128) lane-dense
    tgt = tgt_ref[...].astype(jnp.float32)
    msk = msk_ref[...].astype(jnp.float32)   # per-coordinate {0, 1}

    diff = jnp.abs(off - tgt)
    loss = jnp.where(diff < BETA, diff * diff * _HALF_OVER_BETA,
                     diff - 0.5 * BETA)
    loss = loss * msk
    cnt = msk

    if needs_row_mask:
        # Last tile may extend past the R valid rows; that region is undefined
        # garbage, so select-zero it (jnp.where, not multiply, so any NaN from
        # garbage data does not propagate).
        row = j * tile_r + jax.lax.broadcasted_iota(
            jnp.int32, (1, tile_r, _LANES), 1)
        valid = row < rows_valid
        loss = jnp.where(valid, loss, 0.0)
        cnt = jnp.where(valid, cnt, 0.0)

    # Per-lane partial sums accumulated across row tiles (VPU vreg adds plus a
    # small sublane reduce); the cross-lane reduce happens once in the wrapper.
    num_ref[...] += jnp.sum(loss, axis=1, keepdims=True)
    den_ref[...] += jnp.sum(cnt, axis=1, keepdims=True)


def smooth_l1_loss_pallas(offset, target, cls_target, *, tile_anchors=65536):
    """offset, target: (B, N, C) float; cls_target: (B, N) int. Returns scalar f32."""
    B, N, C = offset.shape
    L = N * C

    # Free contiguous reshape to the flat per-batch layout; expand the class
    # mask per-coordinate as int8 so every coord of an anchor shares its mask.
    off_flat = offset.reshape(B, L)
    tgt_flat = target.reshape(B, L)
    msk_flat = jnp.broadcast_to((cls_target > 0).astype(jnp.int8)[:, :, None],
                                (B, N, C)).reshape(B, L)

    lane_pad = (-L) % _LANES
    if lane_pad:
        # TODO(synk): rare path (N % 32 != 0) still copies the box tensors via
        # jnp.pad; real detection anchor counts never hit this.
        off_flat = jnp.pad(off_flat, ((0, 0), (0, lane_pad)))
        tgt_flat = jnp.pad(tgt_flat, ((0, 0), (0, lane_pad)))
        msk_flat = jnp.pad(msk_flat, ((0, 0), (0, lane_pad)))
    Lp = L + lane_pad
    R = Lp // _LANES  # lane-dense rows per batch

    off3 = off_flat.reshape(B, R, _LANES)
    tgt3 = tgt_flat.reshape(B, R, _LANES)
    msk3 = msk_flat.reshape(B, R, _LANES)

    # ~tile_anchors anchors per grid step (C coords/anchor, 128 lanes per row).
    target_rows = max(8, (tile_anchors * C // _LANES) // 8 * 8)
    tile_r = R if R <= target_rows else target_rows
    n_tiles = pl.cdiv(R, tile_r)
    needs_row_mask = (n_tiles * tile_r != R)

    kernel = functools.partial(_smooth_l1_kernel, tile_r=tile_r,
                               rows_valid=R, needs_row_mask=needs_row_mask)

    num, den = pl.pallas_call(
        kernel,
        out_shape=(
            jax.ShapeDtypeStruct((B, 1, _LANES), jnp.float32),
            jax.ShapeDtypeStruct((B, 1, _LANES), jnp.float32),
        ),
        grid=(B, n_tiles),
        in_specs=[
            pl.BlockSpec((1, tile_r, _LANES), lambda b, j: (b, j, 0)),
            pl.BlockSpec((1, tile_r, _LANES), lambda b, j: (b, j, 0)),
            pl.BlockSpec((1, tile_r, _LANES), lambda b, j: (b, j, 0)),
        ],
        out_specs=(
            pl.BlockSpec((1, 1, _LANES), lambda b, j: (b, 0, 0)),
            pl.BlockSpec((1, 1, _LANES), lambda b, j: (b, 0, 0)),
        ),
        compiler_params=pltpu.CompilerParams(
            dimension_semantics=("parallel", "arbitrary")),
    )(off3, tgt3, msk3)

    # Finalize: 128-lane reduce, per-coord counts -> per-anchor counts, clamp
    # to 1, per-batch normalize, batch mean.
    num_b = num[:, 0, :].sum(axis=-1)
    den_b = den[:, 0, :].sum(axis=-1) / jnp.float32(C)
    per_batch = num_b / jnp.maximum(den_b, jnp.float32(1.0))
    return per_batch.mean()


def _reference(offset, target, cls_target):
    diff = jnp.abs(offset - target)
    loss = jnp.where(diff < BETA, 0.5 * diff * diff / BETA, diff - 0.5 * BETA)
    mask = (cls_target > 0).astype(jnp.float32)
    loss_raw = loss.sum(2) * mask
    per_batch = loss_raw.sum(1) / jnp.maximum(mask.sum(1), 1.0)
    return per_batch.mean()


if __name__ == "__main__":
    key = jax.random.PRNGKey(0)
    k1, k2, k3 = jax.random.split(key, 3)

    B, N, C = 2, 128, 4   # batch, anchors, box coords
    offset = jax.random.normal(k1, (B, N, C), dtype=jnp.float32)
    target = jax.random.normal(k2, (B, N, C), dtype=jnp.float32)
    # class targets in {-1, 0, 1, 2}; positives are > 0
    cls_target = jax.random.randint(k3, (B, N), -1, 3, dtype=jnp.int32)

    loss = jax.jit(smooth_l1_loss_pallas)(offset, target, cls_target)
    loss = jax.block_until_ready(loss)

    ref = _reference(offset, target, cls_target)
    assert jnp.allclose(loss, ref, rtol=1e-5, atol=1e-5), (loss, ref)

    print("KERNEL_OK")
</pallas_src>

<mosaic_0001>
module attributes {stable_mosaic.version = 11 : i64} {
  func.func @_smooth_l1_kernel(%arg0: i32, %arg1: i32, %arg2: memref<1x4x128xf32, #tpu.memory_space<vmem>>, %arg3: memref<1x4x128xf32, #tpu.memory_space<vmem>>, %arg4: memref<1x4x128xi8, #tpu.memory_space<vmem>>, %arg5: memref<1x1x128xf32, #tpu.memory_space<vmem>>, %arg6: memref<1x1x128xf32, #tpu.memory_space<vmem>>) attributes {dimension_semantics = [#tpu.dimension_semantics<parallel>, #tpu.dimension_semantics<arbitrary>], iteration_bounds = array<i64: 2, 1>, scalar_prefetch = 0 : i64, scratch_operands = 0 : i64, tpu.core_type = #tpu.core_type<tc>, window_params = [{transform_indices = @transform_0, window_bounds = array<i64: 1, 4, 128>}, {transform_indices = @transform_1, window_bounds = array<i64: 1, 4, 128>}, {transform_indices = @transform_2, window_bounds = array<i64: 1, 4, 128>}, {transform_indices = @transform_3, window_bounds = array<i64: 1, 1, 128>}, {transform_indices = @transform_4, window_bounds = array<i64: 1, 1, 128>}]} {
    %c0_i32 = arith.constant 0 : i32
    %0 = arith.cmpi eq, %arg1, %c0_i32 : i32
    %1 = arith.extui %0 : i1 to i32
    %c0_i32_0 = arith.constant 0 : i32
    %2 = arith.cmpi ne, %1, %c0_i32_0 : i32
    scf.if %2 {
      %cst_25 = arith.constant 0.000000e+00 : f32
      %28 = vector.broadcast %cst_25 : f32 to vector<1x1x128xf32>
      %c0_26 = arith.constant 0 : index
      %c0_27 = arith.constant 0 : index
      %c0_28 = arith.constant 0 : index
      %29 = vector.load %arg5[%c0_26, %c0_27, %c0_28] : memref<1x1x128xf32, #tpu.memory_space<vmem>>, vector<1x1x128xf32>
      tpu.vector_store %arg5[%c0_26, %c0_27, %c0_28], %28 {strides = array<i32>} : memref<1x1x128xf32, #tpu.memory_space<vmem>>, vector<1x1x128xf32>,
      %cst_29 = arith.constant 0.000000e+00 : f32
      %30 = vector.broadcast %cst_29 : f32 to vector<1x1x128xf32>
      %c0_30 = arith.constant 0 : index
      %c0_31 = arith.constant 0 : index
      %c0_32 = arith.constant 0 : index
      %31 = vector.load %arg6[%c0_30, %c0_31, %c0_32] : memref<1x1x128xf32, #tpu.memory_space<vmem>>, vector<1x1x128xf32>
      tpu.vector_store %arg6[%c0_30, %c0_31, %c0_32], %30 {strides = array<i32>} : memref<1x1x128xf32, #tpu.memory_space<vmem>>, vector<1x1x128xf32>,
    } else {
    }
    %c0 = arith.constant 0 : index
    %c0_1 = arith.constant 0 : index
    %c0_2 = arith.constant 0 : index
    %3 = vector.load %arg2[%c0, %c0_1, %c0_2] : memref<1x4x128xf32, #tpu.memory_space<vmem>>, vector<1x4x128xf32>
    %c0_3 = arith.constant 0 : index
    %c0_4 = arith.constant 0 : index
    %c0_5 = arith.constant 0 : index
    %4 = vector.load %arg3[%c0_3, %c0_4, %c0_5] : memref<1x4x128xf32, #tpu.memory_space<vmem>>, vector<1x4x128xf32>
    %c0_6 = arith.constant 0 : index
    %c0_7 = arith.constant 0 : index
    %c0_8 = arith.constant 0 : index
    %5 = vector.load %arg4[%c0_6, %c0_7, %c0_8] : memref<1x4x128xi8, #tpu.memory_space<vmem>>, vector<1x4x128xi8>
    %6 = arith.sitofp %5 : vector<1x4x128xi8> to vector<1x4x128xf32>
    %7 = arith.subf %3, %4 : vector<1x4x128xf32>
    %8 = math.absf %7 : vector<1x4x128xf32>
    %cst = arith.constant 1.100000e-01 : f32
    %9 = vector.broadcast %cst : f32 to vector<1x4x128xf32>
    %10 = arith.cmpf olt, %8, %9 : vector<1x4x128xf32>
    %11 = arith.mulf %8, %8 : vector<1x4x128xf32>
    %cst_9 = arith.constant 4.5454545 : f32
    %12 = vector.broadcast %cst_9 : f32 to vector<1x4x128xf32>
    %13 = arith.mulf %11, %12 : vector<1x4x128xf32>
    %cst_10 = arith.constant 5.500000e-02 : f32
    %14 = vector.broadcast %cst_10 : f32 to vector<1x4x128xf32>
    %15 = arith.subf %8, %14 : vector<1x4x128xf32>
    %16 = arith.select %10, %13, %15 : vector<1x4x128xi1>, vector<1x4x128xf32>
    %17 = arith.mulf %16, %6 : vector<1x4x128xf32>
    %c0_11 = arith.constant 0 : index
    %c0_12 = arith.constant 0 : index
    %c0_13 = arith.constant 0 : index
    %18 = vector.load %arg5[%c0_11, %c0_12, %c0_13] : memref<1x1x128xf32, #tpu.memory_space<vmem>>, vector<1x1x128xf32>
    %cst_14 = arith.constant dense<0.000000e+00> : vector<1x128xf32>
    %19 = vector.multi_reduction <add>, %17, %cst_14 [1] : vector<1x4x128xf32> to vector<1x128xf32>
    %20 = vector.shape_cast %19 : vector<1x128xf32> to vector<1x1x128xf32>
    %21 = arith.addf %18, %20 : vector<1x1x128xf32>
    %c0_15 = arith.constant 0 : index
    %c0_16 = arith.constant 0 : index
    %c0_17 = arith.constant 0 : index
    %22 = vector.load %arg5[%c0_15, %c0_16, %c0_17] : memref<1x1x128xf32, #tpu.memory_space<vmem>>, vector<1x1x128xf32>
    tpu.vector_store %arg5[%c0_15, %c0_16, %c0_17], %21 {strides = array<i32>} : memref<1x1x128xf32, #tpu.memory_space<vmem>>, vector<1x1x128xf32>,
    %c0_18 = arith.constant 0 : index
    %c0_19 = arith.constant 0 : index
    %c0_20 = arith.constant 0 : index
    %23 = vector.load %arg6[%c0_18, %c0_19, %c0_20] : memref<1x1x128xf32, #tpu.memory_space<vmem>>, vector<1x1x128xf32>
    %cst_21 = arith.constant dense<0.000000e+00> : vector<1x128xf32>
    %24 = vector.multi_reduction <add>, %6, %cst_21 [1] : vector<1x4x128xf32> to vector<1x128xf32>
    %25 = vector.shape_cast %24 : vector<1x128xf32> to vector<1x1x128xf32>
    %26 = arith.addf %23, %25 : vector<1x1x128xf32>
    %c0_22 = arith.constant 0 : index
    %c0_23 = arith.constant 0 : index
    %c0_24 = arith.constant 0 : index
    %27 = vector.load %arg6[%c0_22, %c0_23, %c0_24] : memref<1x1x128xf32, #tpu.memory_space<vmem>>, vector<1x1x128xf32>
    tpu.vector_store %arg6[%c0_22, %c0_23, %c0_24], %26 {strides = array<i32>} : memref<1x1x128xf32, #tpu.memory_space<vmem>>, vector<1x1x128xf32>,
    return
  }
  func.func @transform_0(%arg0: i32, %arg1: i32) -> (i32, i32, i32) {
    %c0_i32 = arith.constant 0 : i32
    %c0_i32_0 = arith.constant 0 : i32
    return %arg0, %arg1, %c0_i32 : i32, i32, i32
  }
  func.func @transform_1(%arg0: i32, %arg1: i32) -> (i32, i32, i32) {
    %c0_i32 = arith.constant 0 : i32
    %c0_i32_0 = arith.constant 0 : i32
    return %arg0, %arg1, %c0_i32 : i32, i32, i32
  }
  func.func @transform_2(%arg0: i32, %arg1: i32) -> (i32, i32, i32) {
    %c0_i32 = arith.constant 0 : i32
    %c0_i32_0 = arith.constant 0 : i32
    return %arg0, %arg1, %c0_i32 : i32, i32, i32
  }
  func.func @transform_3(%arg0: i32, %arg1: i32) -> (i32, i32, i32) {
    %c0_i32 = arith.constant 0 : i32
    %c0_i32_0 = arith.constant 0 : i32
    %c0_i32_1 = arith.constant 0 : i32
    return %arg0, %c0_i32, %c0_i32_0 : i32, i32, i32
  }
  func.func @transform_4(%arg0: i32, %arg1: i32) -> (i32, i32, i32) {
    %c0_i32 = arith.constant 0 : i32
    %c0_i32_0 = arith.constant 0 : i32
    %c0_i32_1 = arith.constant 0 : i32
    return %arg0, %c0_i32, %c0_i32_0 : i32, i32, i32
  }
}

</mosaic_0001>

<bundles_post_ra>
// kernel: smooth_l1_loss_pallas.1
= control target key start
LH: loop header
LB: loop body
LE: loop exit
PB: predicated region body
PF: predicated region fallthrough
CT: control target
= control target key end

     0   :  { %s511_s15 = smov 0   ;;  %s513_s16 = smov 0   ;;  %s558_s0 = inlined_call_operand.vmem [shape: f32[2,4,128], index: 0, kind: input, shape index: {}]   ;;  %s559_s1 = inlined_call_operand.vmem [shape: f32[2,4,128], index: 1, kind: input, shape index: {}]   ;;  %s560_s2 = inlined_call_operand.vmem [shape: s8[2,4,128], index: 2, kind: input, shape index: {}]   ;;  %s561_s3 = inlined_call_operand.vmem [shape: f32[2,1,128], index: 3, kind: output, shape index: {0}]   ;;  %s562_s4 = inlined_call_operand.vmem [shape: f32[2,1,128], index: 4, kind: output, shape index: {1}]  }
   0x1   :  { %s515_s17 = smov 0  }
   0x2 LB: > { %s27_s18 = sadd.s32 1, %s479_s16  ;;  %p430_p0 = scmp.ge.s32.totalorder %s483_s17, 1  ;;  %s483_s17 = sphi %s515_s17, %s15_s17   ;;  %s479_s16 = sphi %s513_s16, %s564_s16   ;;  %s475_s15 = sphi %s511_s15, %s563_s15  }
   0x3   : > { %p29_p1 = scmp.ge.s32.totalorder %s27_s18, 2  ;;  %p208_p2 = scmp.lt.s32.totalorder %s483_s17, 3 }
   0x5   : > { %s566_s18 = smov (%p29_p1, %s27_s18), 0  ;;  %p209_p3 = pnand %p430_p0, %p208_p2 }
   0x6   : > { %p250_p4 = scmp.lt.s32.totalorder (!%p209_p3), %s475_s15, 1 }
   0x7   : > { %212 = sbr.rel (%p209_p3) target bundleno = 44 (0x2c), region = 32 }
   0xc   : > { %s568_s15 = smov (!%p250_p4, %s475_s15), 1  ;;  %v485_v0 = vmov 0.0   ;;  %vm296_vm0 = vcmask 1043456  }
   0xd   : > { %s431_s19 = sshll.u32 %s568_s15, 2  ;;  %s532_s22 = scalar_lea.vmem %s561_s3, %s568_s15 }
   0xe   : > { %s256_s25 = scalar_lea.vmem %s558_s0, %s431_s19  ;;  %s263_s28 = scalar_lea.vmem %s559_s1, %s431_s19  ;;  %280 = vst [vmem:[%s532_s22] sm:$0x1] %v485_v0 }
   0xf   : > { %v282_v1 = vld [vmem:[%s256_s25] sm:$0xf]  ;;  %s275_s5 = scalar_lea.vmem %s562_s4, %s568_s15  ;;  %s269_s8 = scalar_lea.vmem %s560_s2, %s568_s15 }
  0x10   : > { %v283_v2 = vld [vmem:[%s263_s28] sm:$0xf]  ;;  %281 = vst [vmem:[%s275_s5] sm:$0x1] %v485_v0 }
  0x11   : > { %v287_v3 = vsub.f32 %v282_v1, %v283_v2  ;;  %v284_v4 = vld [vmem:[%s269_s8] sm:$0x1] }
  0x12   : > { %v285_v5 = vunpack.c.0.s8 %v284_v4 }
  0x13   : > { %v288_v6 = vand.u32 2147483647, %v287_v3 }
  0x14   : > { %v286_v7 = vcvt.s32.f32 %v285_v5 }
  0x15   : > { %v290_v8 = vmul.f32 %v288_v6, %v288_v6  ;;  %v433_v9 = vadd.f32 -0.055, %v288_v6  ;;  %vm289_vm1 = vcmp.lt.f32.partialorder %v288_v6, 0.11  ;;  %v295_v28 = vld [vmem:[%s532_s22] sm:$0x1] }
  0x16   : > { %v307_v10 = vsel %vm296_vm0, %v286_v7, 0.0 }
  0x17   : > { %v291_v11 = vmul.f32 4.5454545, %v290_v8  ;;  %v308_v12 = vrot.slane %v307_v10, 4  ;;  %v306_v22 = vld [vmem:[%s275_s5] sm:$0x1] }
  0x19   : > { %v293_v13 = vsel %vm289_vm1, %v291_v11, %v433_v9  ;;  %v309_v14 = vadd.f32 %v308_v12, %v307_v10 }
  0x1a   : > { %v294_v15 = vmul.f32 %v293_v13, %v286_v7 }
  0x1b   : > { %v310_v16 = vrot.slane %v309_v14, 2 }
  0x1c   : > { %v297_v17 = vsel %vm296_vm0, %v294_v15, 0.0 }
  0x1d   : > { %v298_v18 = vrot.slane %v297_v17, 4  ;;  %v311_v19 = vadd.f32 %v310_v16, %v309_v14 }
  0x1f   : > { %v299_v20 = vadd.f32 %v298_v18, %v297_v17  ;;  %v312_v21 = vrot.slane %v311_v19, 1 }
  0x21   : > { %v300_v23 = vrot.slane %v299_v20, 2  ;;  %v313_v24 = vadd.f32 %v312_v21, %v311_v19 }
  0x23   : > { %v301_v25 = vadd.f32 %v300_v23, %v299_v20  ;;  %v314_v26 = vadd.f32 %v313_v24, %v306_v22 }
  0x25   : > { %v302_v27 = vrot.slane %v301_v25, 1  ;;  %315 = vst [vmem:[%s275_s5] sm:$0x1] %v314_v26 }
  0x27   : > { %v303_v29 = vadd.f32 %v302_v27, %v301_v25 }
  0x29   : > { %v304_v30 = vadd.f32 %v303_v29, %v295_v28 }
  0x2b   : > { %305 = vst [vmem:[%s532_s22] sm:$0x1] %v304_v30 }
  0x2c PF: > { %s15_s17 = sadd.s32 1, %s483_s17   ;;  %s563_s15 = smov %s479_s16 }
  0x2d   : > { %p12_p5 = scmp.ge.s32.totalorder %s15_s17, 4   ;;  %s564_s16 = smov %s566_s18 }
  0x2f   :  { %14 = sbr.rel (!%p12_p5) target bundleno = 2 (0x2), region = 84 }

</bundles_post_ra>
